<compile_context>
chip_gen: v7x
topology: tpu7x:2x2x1
jax: 0.10.0
libtpu: 0.0.40
codegen_flags: <defaults>
</compile_context>

<pallas_src>
import functools

import jax
import jax.numpy as jnp
import numpy as np
from jax.experimental import pallas as pl
from jax.experimental.pallas import tpu as pltpu

_HID = 128  # hidden width fixed by the PyTorch module


def _round_up(x, m):
    return (x + m - 1) // m * m


def _mish(x):
    # x * tanh(softplus(x)) with one EUP exp + one approx reciprocal (f32 math).
    e = jnp.exp(jnp.minimum(x, 20.0))            # clamp: tanh(softplus(x)) == 1 beyond ~20
    t2 = (1.0 + e) * (1.0 + e)
    return x * ((t2 - 1.0) * pl.reciprocal(t2 + 1.0, approx=True))


def _actor_critic_kernel(state_ref, w1_ref, b1_ref, w2_ref, b2_ref,
                         w3a_ref, b3a_ref, w3c_ref, b3c_ref, out_ref):
    x = state_ref[...]
    wdt = w1_ref.dtype

    # Layer 1: actor & critic fused along the output (lane) axis: [TM,S] @ [S,256].
    h1 = jnp.dot(x.astype(wdt), w1_ref[...], preferred_element_type=jnp.float32)
    h1 = h1 + b1_ref[...].astype(jnp.float32)
    m1 = _mish(h1)

    # Layer 2: block-diagonal packed weights: [TM,256] @ [256,256].
    h2 = jnp.dot(m1.astype(wdt), w2_ref[...], preferred_element_type=jnp.float32)
    h2 = h2 + b2_ref[...].astype(jnp.float32)
    m2 = _mish(h2)

    h2a = m2[:, :_HID]       # actor features  (128-lane aligned slice)
    h2c = m2[:, _HID:]       # critic features

    # Actor head + numerically stable softmax.  Padded logit lanes carry bias -1e30
    # so they contribute exp(...) == 0 and never disturb the normalization.
    logits = jnp.dot(h2a.astype(wdt), w3a_ref[...], preferred_element_type=jnp.float32)
    logits = logits + b3a_ref[...].astype(jnp.float32)
    lmax = jnp.max(logits, axis=-1, keepdims=True)
    p = jnp.exp(logits - lmax)
    probs = p * pl.reciprocal(jnp.sum(p, axis=-1, keepdims=True), approx=True)

    # Critic head: padded weights are zero except column `action_dim`, so the value
    # lands in lane `action_dim` and every other lane is exactly 0.
    vslab = jnp.dot(h2c.astype(wdt), w3c_ref[...], preferred_element_type=jnp.float32)
    vslab = vslab + b3c_ref[...].astype(jnp.float32)

    out_ref[...] = probs + vslab


def init_actor_critic_params(key, state_dim, action_dim, dtype=jnp.float32):
    """Raw per-layer params, layout [in_features, out_features] (y = x @ W + b)."""
    ks = jax.random.split(key, 12)

    def lin(kw, kb, fan_in, fan_out):
        bound = 1.0 / np.sqrt(fan_in)
        w = jax.random.uniform(kw, (fan_in, fan_out), jnp.float32, -bound, bound)
        b = jax.random.uniform(kb, (fan_out,), jnp.float32, -bound, bound)
        return w.astype(dtype), b.astype(dtype)

    a_w1, a_b1 = lin(ks[0], ks[1], state_dim, _HID)
    a_w2, a_b2 = lin(ks[2], ks[3], _HID, _HID)
    a_w3, a_b3 = lin(ks[4], ks[5], _HID, action_dim)
    c_w1, c_b1 = lin(ks[6], ks[7], state_dim, _HID)
    c_w2, c_b2 = lin(ks[8], ks[9], _HID, _HID)
    c_w3, c_b3 = lin(ks[10], ks[11], _HID, 1)
    return dict(a_w1=a_w1, a_b1=a_b1, a_w2=a_w2, a_b2=a_b2, a_w3=a_w3, a_b3=a_b3,
                c_w1=c_w1, c_b1=c_b1, c_w2=c_w2, c_b2=c_b2, c_w3=c_w3, c_b3=c_b3)


def pack_actor_critic_params(raw, state_dim, action_dim, param_dtype=jnp.float32):
    """Pack per-layer weights into the fused, lane-aligned layout the kernel expects.

    param_dtype=jnp.bfloat16 feeds the MXU bf16 on v6e/v7x; biases stay f32.
    """
    s_pad = _round_up(max(state_dim, 1), 128)
    out_lanes = _round_up(action_dim + 1, 128)
    f32 = lambda a: jnp.asarray(a, jnp.float32)

    # Layer 1: [actor | critic] along the output lanes, input rows zero-padded to s_pad.
    w1 = jnp.zeros((s_pad, 2 * _HID), jnp.float32)
    w1 = w1.at[:state_dim, :_HID].set(f32(raw["a_w1"]))
    w1 = w1.at[:state_dim, _HID:].set(f32(raw["c_w1"]))
    b1 = jnp.concatenate([f32(raw["a_b1"]), f32(raw["c_b1"])])[None, :]

    # Layer 2: block-diagonal so one [256,256] matmul serves both stacks.
    w2 = jnp.zeros((2 * _HID, 2 * _HID), jnp.float32)
    w2 = w2.at[:_HID, :_HID].set(f32(raw["a_w2"]))
    w2 = w2.at[_HID:, _HID:].set(f32(raw["c_w2"]))
    b2 = jnp.concatenate([f32(raw["a_b2"]), f32(raw["c_b2"])])[None, :]

    # Actor head: output lanes padded to out_lanes; padded lanes get bias -1e30.
    w3a = jnp.zeros((_HID, out_lanes), jnp.float32).at[:, :action_dim].set(f32(raw["a_w3"]))
    b3a = jnp.full((out_lanes,), -1e30, jnp.float32).at[:action_dim].set(f32(raw["a_b3"]))[None, :]

    # Critic head: value weights live in column `action_dim`, zeros elsewhere.
    w3c = jnp.zeros((_HID, out_lanes), jnp.float32).at[:, action_dim].set(f32(raw["c_w3"])[:, 0])
    b3c = jnp.zeros((out_lanes,), jnp.float32).at[action_dim].set(f32(raw["c_b3"])[0])[None, :]

    packed = dict(w1=w1, b1=b1, w2=w2, b2=b2, w3a=w3a, b3a=b3a, w3c=w3c, b3c=b3c)
    for k in ("w1", "w2", "w3a", "w3c"):
        packed[k] = packed[k].astype(param_dtype)
    return packed


def actor_critic_forward(state, packed, *, action_dim, block_rows=512):
    """Fused actor+critic forward. Returns (probs [B, action_dim], value [B, 1])."""
    B, S = state.shape
    s_pad = packed["w1"].shape[0]
    out_lanes = packed["w3a"].shape[1]
    assert S <= s_pad and action_dim < out_lanes

    tm = min(block_rows, _round_up(B, 8))       # large batch tile, multiple of 8
    b_pad = _round_up(B, tm)
    grid = (b_pad // tm,)

    # Zero-pad batch rows / state features to the aligned tile shape.
    x = jnp.zeros((b_pad, s_pad), jnp.float32).at[:B, :S].set(state.astype(jnp.float32))

    def const(shape):
        # Constant block index -> parameter stays resident in VMEM across grid steps.
        return pl.BlockSpec(shape, lambda i: (0, 0))

    out = pl.pallas_call(
        _actor_critic_kernel,
        out_shape=jax.ShapeDtypeStruct((b_pad, out_lanes), jnp.float32),
        grid=grid,
        in_specs=[
            pl.BlockSpec((tm, s_pad), lambda i: (i, 0)),    # streamed state tile
            const(packed["w1"].shape), const(packed["b1"].shape),
            const(packed["w2"].shape), const(packed["b2"].shape),
            const(packed["w3a"].shape), const(packed["b3a"].shape),
            const(packed["w3c"].shape), const(packed["b3c"].shape),
        ],
        out_specs=pl.BlockSpec((tm, out_lanes), lambda i: (i, 0)),  # lane-dense packed slab
        compiler_params=pltpu.CompilerParams(dimension_semantics=("parallel",)),
    )(x, packed["w1"], packed["b1"], packed["w2"], packed["b2"],
      packed["w3a"], packed["b3a"], packed["w3c"], packed["b3c"])

    probs = out[:B, :action_dim]
    value = out[:B, action_dim:action_dim + 1]
    return probs, value


# ------------------------- pure-JAX reference (for checking) -------------------------
def _mish_ref(x):
    return x * jnp.tanh(jax.nn.softplus(x))


def reference_forward(state, raw):
    a = _mish_ref(state @ raw["a_w1"] + raw["a_b1"])
    a = _mish_ref(a @ raw["a_w2"] + raw["a_b2"])
    probs = jax.nn.softmax(a @ raw["a_w3"] + raw["a_b3"], axis=-1)
    c = _mish_ref(state @ raw["c_w1"] + raw["c_b1"])
    c = _mish_ref(c @ raw["c_w2"] + raw["c_b2"])
    value = c @ raw["c_w3"] + raw["c_b3"]
    return probs, value


# TODO(synk): Categorical sampling / log_prob / entropy and the action-mask renormalize
# (torch.distributions glue in act/evaluate) are cheap host/XLA ops kept outside the kernel.
if __name__ == "__main__":
    key = jax.random.PRNGKey(0)
    k_params, k_state = jax.random.split(key)

    batch, state_dim, action_dim = 4, 24, 6     # small demo shapes
    raw = init_actor_critic_params(k_params, state_dim, action_dim)
    packed = pack_actor_critic_params(raw, state_dim, action_dim)
    state = jax.random.normal(k_state, (batch, state_dim), jnp.float32)

    fwd = jax.jit(functools.partial(actor_critic_forward, action_dim=action_dim))
    probs, value = fwd(state, packed)
    jax.block_until_ready((probs, value))

    ref_probs, ref_value = reference_forward(state, raw)
    np.testing.assert_allclose(np.asarray(probs), np.asarray(ref_probs), rtol=5e-2, atol=5e-3)
    np.testing.assert_allclose(np.asarray(value), np.asarray(ref_value), rtol=5e-2, atol=5e-3)
    assert np.allclose(np.asarray(probs).sum(-1), 1.0, atol=5e-3)

    print("KERNEL_OK")
</pallas_src>

<mosaic_0001>
module attributes {stable_mosaic.version = 11 : i64} {
  func.func @_actor_critic_kernel(%arg0: i32, %arg1: memref<8x128xf32, #tpu.memory_space<vmem>>, %arg2: memref<128x256xf32, #tpu.memory_space<vmem>>, %arg3: memref<1x256xf32, #tpu.memory_space<vmem>>, %arg4: memref<256x256xf32, #tpu.memory_space<vmem>>, %arg5: memref<1x256xf32, #tpu.memory_space<vmem>>, %arg6: memref<128x128xf32, #tpu.memory_space<vmem>>, %arg7: memref<1x128xf32, #tpu.memory_space<vmem>>, %arg8: memref<128x128xf32, #tpu.memory_space<vmem>>, %arg9: memref<1x128xf32, #tpu.memory_space<vmem>>, %arg10: memref<8x128xf32, #tpu.memory_space<vmem>>) attributes {dimension_semantics = [#tpu.dimension_semantics<parallel>], iteration_bounds = array<i64: 1>, scalar_prefetch = 0 : i64, scratch_operands = 0 : i64, tpu.core_type = #tpu.core_type<tc>, window_params = [{transform_indices = @transform_0, window_bounds = array<i64: 8, 128>}, {pipeline_mode = #tpu.pipeline_mode<synchronous>, transform_indices = @transform_1, window_bounds = array<i64: 128, 256>}, {pipeline_mode = #tpu.pipeline_mode<synchronous>, transform_indices = @transform_2, window_bounds = array<i64: 1, 256>}, {pipeline_mode = #tpu.pipeline_mode<synchronous>, transform_indices = @transform_3, window_bounds = array<i64: 256, 256>}, {pipeline_mode = #tpu.pipeline_mode<synchronous>, transform_indices = @transform_4, window_bounds = array<i64: 1, 256>}, {pipeline_mode = #tpu.pipeline_mode<synchronous>, transform_indices = @transform_5, window_bounds = array<i64: 128, 128>}, {pipeline_mode = #tpu.pipeline_mode<synchronous>, transform_indices = @transform_6, window_bounds = array<i64: 1, 128>}, {pipeline_mode = #tpu.pipeline_mode<synchronous>, transform_indices = @transform_7, window_bounds = array<i64: 128, 128>}, {pipeline_mode = #tpu.pipeline_mode<synchronous>, transform_indices = @transform_8, window_bounds = array<i64: 1, 128>}, {transform_indices = @transform_9, window_bounds = array<i64: 8, 128>}]} {
    %c0 = arith.constant 0 : index
    %c0_0 = arith.constant 0 : index
    %0 = vector.load %arg1[%c0, %c0_0] : memref<8x128xf32, #tpu.memory_space<vmem>>, vector<8x128xf32>
    %c0_1 = arith.constant 0 : index
    %c0_2 = arith.constant 0 : index
    %1 = vector.load %arg2[%c0_1, %c0_2] : memref<128x256xf32, #tpu.memory_space<vmem>>, vector<128x256xf32>
    %cst = arith.constant dense<0.000000e+00> : vector<8x256xf32>
    %2 = tpu.matmul %0, %1, %cst {dimension_numbers = #tpu.dot_dimension_numbers<[1], [0], [0], [1], [0, 0, 1, 1], [], []>} : vector<8x128xf32>, vector<128x256xf32>, vector<8x256xf32> -> vector<8x256xf32>
    %c0_3 = arith.constant 0 : index
    %c0_4 = arith.constant 0 : index
    %3 = vector.load %arg3[%c0_3, %c0_4] : memref<1x256xf32, #tpu.memory_space<vmem>>, vector<1x256xf32>
    %4 = vector.broadcast %3 : vector<1x256xf32> to vector<8x256xf32>
    %5 = arith.addf %2, %4 : vector<8x256xf32>
    %cst_5 = arith.constant 2.000000e+01 : f32
    %6 = vector.broadcast %cst_5 : f32 to vector<8x256xf32>
    %7 = arith.minimumf %5, %6 : vector<8x256xf32>
    %8 = math.exp %7 : vector<8x256xf32>
    %cst_6 = arith.constant 1.000000e+00 : f32
    %9 = vector.broadcast %cst_6 : f32 to vector<8x256xf32>
    %10 = arith.addf %9, %8 : vector<8x256xf32>
    %cst_7 = arith.constant 1.000000e+00 : f32
    %11 = vector.broadcast %cst_7 : f32 to vector<8x256xf32>
    %12 = arith.addf %11, %8 : vector<8x256xf32>
    %13 = arith.mulf %10, %12 : vector<8x256xf32>
    %cst_8 = arith.constant 1.000000e+00 : f32
    %14 = vector.broadcast %cst_8 : f32 to vector<8x256xf32>
    %15 = arith.subf %13, %14 : vector<8x256xf32>
    %cst_9 = arith.constant 1.000000e+00 : f32
    %16 = vector.broadcast %cst_9 : f32 to vector<8x256xf32>
    %17 = arith.addf %13, %16 : vector<8x256xf32>
    %18 = tpu.reciprocal %17 {approx = true} : vector<8x256xf32> -> vector<8x256xf32>
    %19 = arith.mulf %15, %18 : vector<8x256xf32>
    %20 = arith.mulf %5, %19 : vector<8x256xf32>
    %c0_10 = arith.constant 0 : index
    %c0_11 = arith.constant 0 : index
    %21 = vector.load %arg4[%c0_10, %c0_11] : memref<256x256xf32, #tpu.memory_space<vmem>>, vector<256x256xf32>
    %cst_12 = arith.constant dense<0.000000e+00> : vector<8x256xf32>
    %22 = tpu.matmul %20, %21, %cst_12 {dimension_numbers = #tpu.dot_dimension_numbers<[1], [0], [0], [1], [0, 0, 1, 1], [], []>} : vector<8x256xf32>, vector<256x256xf32>, vector<8x256xf32> -> vector<8x256xf32>
    %c0_13 = arith.constant 0 : index
    %c0_14 = arith.constant 0 : index
    %23 = vector.load %arg5[%c0_13, %c0_14] : memref<1x256xf32, #tpu.memory_space<vmem>>, vector<1x256xf32>
    %24 = vector.broadcast %23 : vector<1x256xf32> to vector<8x256xf32>
    %25 = arith.addf %22, %24 : vector<8x256xf32>
    %cst_15 = arith.constant 2.000000e+01 : f32
    %26 = vector.broadcast %cst_15 : f32 to vector<8x256xf32>
    %27 = arith.minimumf %25, %26 : vector<8x256xf32>
    %28 = math.exp %27 : vector<8x256xf32>
    %cst_16 = arith.constant 1.000000e+00 : f32
    %29 = vector.broadcast %cst_16 : f32 to vector<8x256xf32>
    %30 = arith.addf %29, %28 : vector<8x256xf32>
    %cst_17 = arith.constant 1.000000e+00 : f32
    %31 = vector.broadcast %cst_17 : f32 to vector<8x256xf32>
    %32 = arith.addf %31, %28 : vector<8x256xf32>
    %33 = arith.mulf %30, %32 : vector<8x256xf32>
    %cst_18 = arith.constant 1.000000e+00 : f32
    %34 = vector.broadcast %cst_18 : f32 to vector<8x256xf32>
    %35 = arith.subf %33, %34 : vector<8x256xf32>
    %cst_19 = arith.constant 1.000000e+00 : f32
    %36 = vector.broadcast %cst_19 : f32 to vector<8x256xf32>
    %37 = arith.addf %33, %36 : vector<8x256xf32>
    %38 = tpu.reciprocal %37 {approx = true} : vector<8x256xf32> -> vector<8x256xf32>
    %39 = arith.mulf %35, %38 : vector<8x256xf32>
    %40 = arith.mulf %25, %39 : vector<8x256xf32>
    %41 = vector.extract_strided_slice %40 {offsets = [0, 0], sizes = [8, 128], strides = [1, 1]} : vector<8x256xf32> to vector<8x128xf32>
    %42 = vector.extract_strided_slice %40 {offsets = [0, 128], sizes = [8, 128], strides = [1, 1]} : vector<8x256xf32> to vector<8x128xf32>
    %c0_20 = arith.constant 0 : index
    %c0_21 = arith.constant 0 : index
    %43 = vector.load %arg6[%c0_20, %c0_21] : memref<128x128xf32, #tpu.memory_space<vmem>>, vector<128x128xf32>
    %cst_22 = arith.constant dense<0.000000e+00> : vector<8x128xf32>
    %44 = tpu.matmul %41, %43, %cst_22 {dimension_numbers = #tpu.dot_dimension_numbers<[1], [0], [0], [1], [0, 0, 1, 1], [], []>} : vector<8x128xf32>, vector<128x128xf32>, vector<8x128xf32> -> vector<8x128xf32>
    %c0_23 = arith.constant 0 : index
    %c0_24 = arith.constant 0 : index
    %45 = vector.load %arg7[%c0_23, %c0_24] : memref<1x128xf32, #tpu.memory_space<vmem>>, vector<1x128xf32>
    %46 = vector.broadcast %45 : vector<1x128xf32> to vector<8x128xf32>
    %47 = arith.addf %44, %46 : vector<8x128xf32>
    %cst_25 = arith.constant dense<0xFF800000> : vector<8xf32>
    %48 = vector.multi_reduction <maximumf>, %47, %cst_25 [1] : vector<8x128xf32> to vector<8xf32>
    %49 = vector.shape_cast %48 : vector<8xf32> to vector<8x1xf32>
    %50 = vector.broadcast %49 : vector<8x1xf32> to vector<8x128xf32>
    %51 = arith.subf %47, %50 : vector<8x128xf32>
    %52 = math.exp %51 : vector<8x128xf32>
    %cst_26 = arith.constant dense<0.000000e+00> : vector<8xf32>
    %53 = vector.multi_reduction <add>, %52, %cst_26 [1] : vector<8x128xf32> to vector<8xf32>
    %54 = vector.shape_cast %53 : vector<8xf32> to vector<8x1xf32>
    %55 = tpu.reciprocal %54 {approx = true} : vector<8x1xf32> -> vector<8x1xf32>
    %56 = vector.broadcast %55 : vector<8x1xf32> to vector<8x128xf32>
    %57 = arith.mulf %52, %56 : vector<8x128xf32>
    %c0_27 = arith.constant 0 : index
    %c0_28 = arith.constant 0 : index
    %58 = vector.load %arg8[%c0_27, %c0_28] : memref<128x128xf32, #tpu.memory_space<vmem>>, vector<128x128xf32>
    %cst_29 = arith.constant dense<0.000000e+00> : vector<8x128xf32>
    %59 = tpu.matmul %42, %58, %cst_29 {dimension_numbers = #tpu.dot_dimension_numbers<[1], [0], [0], [1], [0, 0, 1, 1], [], []>} : vector<8x128xf32>, vector<128x128xf32>, vector<8x128xf32> -> vector<8x128xf32>
    %c0_30 = arith.constant 0 : index
    %c0_31 = arith.constant 0 : index
    %60 = vector.load %arg9[%c0_30, %c0_31] : memref<1x128xf32, #tpu.memory_space<vmem>>, vector<1x128xf32>
    %61 = vector.broadcast %60 : vector<1x128xf32> to vector<8x128xf32>
    %62 = arith.addf %59, %61 : vector<8x128xf32>
    %63 = arith.addf %57, %62 : vector<8x128xf32>
    %c0_32 = arith.constant 0 : index
    %c0_33 = arith.constant 0 : index
    %64 = vector.load %arg10[%c0_32, %c0_33] : memref<8x128xf32, #tpu.memory_space<vmem>>, vector<8x128xf32>
    tpu.vector_store %arg10[%c0_32, %c0_33], %63 {strides = array<i32>} : memref<8x128xf32, #tpu.memory_space<vmem>>, vector<8x128xf32>,
    return
  }
  func.func @transform_0(%arg0: i32) -> (i32, i32) {
    %c0_i32 = arith.constant 0 : i32
    %c0_i32_0 = arith.constant 0 : i32
    return %arg0, %c0_i32 : i32, i32
  }
  func.func @transform_1(%arg0: i32) -> (i32, i32) {
    %c0_i32 = arith.constant 0 : i32
    %c0_i32_0 = arith.constant 0 : i32
    %c0_i32_1 = arith.constant 0 : i32
    return %c0_i32, %c0_i32_0 : i32, i32
  }
  func.func @transform_2(%arg0: i32) -> (i32, i32) {
    %c0_i32 = arith.constant 0 : i32
    %c0_i32_0 = arith.constant 0 : i32
    %c0_i32_1 = arith.constant 0 : i32
    return %c0_i32, %c0_i32_0 : i32, i32
  }
  func.func @transform_3(%arg0: i32) -> (i32, i32) {
    %c0_i32 = arith.constant 0 : i32
    %c0_i32_0 = arith.constant 0 : i32
    %c0_i32_1 = arith.constant 0 : i32
    return %c0_i32, %c0_i32_0 : i32, i32
  }
  func.func @transform_4(%arg0: i32) -> (i32, i32) {
    %c0_i32 = arith.constant 0 : i32
    %c0_i32_0 = arith.constant 0 : i32
    %c0_i32_1 = arith.constant 0 : i32
    return %c0_i32, %c0_i32_0 : i32, i32
  }
  func.func @transform_5(%arg0: i32) -> (i32, i32) {
    %c0_i32 = arith.constant 0 : i32
    %c0_i32_0 = arith.constant 0 : i32
    %c0_i32_1 = arith.constant 0 : i32
    return %c0_i32, %c0_i32_0 : i32, i32
  }
  func.func @transform_6(%arg0: i32) -> (i32, i32) {
    %c0_i32 = arith.constant 0 : i32
    %c0_i32_0 = arith.constant 0 : i32
    %c0_i32_1 = arith.constant 0 : i32
    return %c0_i32, %c0_i32_0 : i32, i32
  }
  func.func @transform_7(%arg0: i32) -> (i32, i32) {
    %c0_i32 = arith.constant 0 : i32
    %c0_i32_0 = arith.constant 0 : i32
    %c0_i32_1 = arith.constant 0 : i32
    return %c0_i32, %c0_i32_0 : i32, i32
  }
  func.func @transform_8(%arg0: i32) -> (i32, i32) {
    %c0_i32 = arith.constant 0 : i32
    %c0_i32_0 = arith.constant 0 : i32
    %c0_i32_1 = arith.constant 0 : i32
    return %c0_i32, %c0_i32_0 : i32, i32
  }
  func.func @transform_9(%arg0: i32) -> (i32, i32) {
    %c0_i32 = arith.constant 0 : i32
    %c0_i32_0 = arith.constant 0 : i32
    return %arg0, %c0_i32 : i32, i32
  }
}

</mosaic_0001>

<bundles_post_ra>
// kernel: actor_critic_forward.1
= control target key start
LH: loop header
LB: loop body
LE: loop exit
PB: predicated region body
PF: predicated region fallthrough
CT: control target
= control target key end

     0   :  { %14 = vsyncpa [#allocation3], 0  ;;  %s1140_s0 = inlined_call_operand.vmem [shape: f32[8,128], index: 0, kind: input, shape index: {}]   ;;  %s1141_s1 = inlined_call_operand.hbm [shape: f32[128,256], index: 1, kind: input, shape index: {}]   ;;  %s1142_s2 = inlined_call_operand.vmem [shape: f32[1,256], index: 2, kind: input, shape index: {}]   ;;  %s1143_s3 = inlined_call_operand.hbm [shape: f32[256,256], index: 3, kind: input, shape index: {}]   ;;  %s1144_s4 = inlined_call_operand.vmem [shape: f32[1,256], index: 4, kind: input, shape index: {}]   ;;  %s1145_s5 = inlined_call_operand.hbm [shape: f32[128,128], index: 5, kind: input, shape index: {}]   ;;  %s1146_s6 = inlined_call_operand.vmem [shape: f32[1,128], index: 6, kind: input, shape index: {}]   ;;  %s1147_s7 = inlined_call_operand.hbm [shape: f32[128,128], index: 7, kind: input, shape index: {}]   ;;  %s1148_s8 = inlined_call_operand.vmem [shape: f32[1,128], index: 8, kind: input, shape index: {}]   ;;  %s1149_s9 = inlined_call_operand.vmem [shape: f32[8,128], index: 9, kind: output, shape index: {}]  }
   0x1   :  { %15 = vsyncpa [#allocation5], 0 }
   0x2   :  { %16 = vsyncpa [#allocation8], 0  ;;  %s973_s30 = smov [#allocation4]   ;;  %s974_s11 = smov [#allocation2]  }
   0x3   :  { %s38_s10 = sshll.u32 %s973_s30, 4  ;;  %s24_s12 = sshll.u32 %s974_s11, 4  ;;  %s39_s10 = int_to_ptr.vmem [resolvable:$true] %s38_s10  ;;  %s1034_s12 = int_to_ptr.vmem [resolvable:$true] %s24_s12 }
   0x4   :  { %s879_s15 = scalar_lea.hbm %s1143_s3, 8192 }
   0x5   :  { %p880_p0 = scmp.ne.s32.totalorder %s1143_s3, %s879_s15  ;;  %p883_p1 = scmp.lt.u32.totalorder %s879_s15, %s1143_s3 }
   0x7   :  { %p885_p2 = pnand %p883_p1, %p880_p0 }
   0x9   :  { %888 = shalt.err (!%p885_p2)
}
   0xa   :  { %s889_s20 = scalar_lea.vmem %s39_s10, 8192  ;;  %p894_p4 = scmp.lt.s32.totalorder %s39_s10, %s39_s10 }
   0xb   :  { %p890_p3 = scmp.ne.s32.totalorder %s39_s10, %s889_s20  ;;  %p895_p5 = scmp.lt.s32.totalorder %s889_s20, %s889_s20 }
   0xd   :  { %p896_p6 = por %p895_p5, %p894_p4 }
   0xf   :  { %p897_p7 = pnand %p896_p6, %p890_p3 }
  0x11   :  { %900 = shalt.err (!%p897_p7)
}
  0x12   :  { %s975_s21 = smov 256   ;;  %s976_s22 = smov 16  }
  0x13   :  { %44 = dma.hbm_to_vmem [thread:$0]  %s1143_s3, 8192, %s39_s10, [#allocation5], %s975_s21, %s975_s21, %s976_s22  }
  0x14   :  { %s901_s27 = scalar_lea.hbm %s1141_s1, 4096 }
  0x15   :  { %p902_p8 = scmp.ne.s32.totalorder %s1141_s1, %s901_s27  ;;  %p905_p9 = scmp.lt.u32.totalorder %s901_s27, %s1141_s1 }
  0x17   :  { %p907_p10 = pnand %p905_p9, %p902_p8 }
  0x19   :  { %910 = shalt.err (!%p907_p10)
}
  0x1a   :  { %s911_s13 = scalar_lea.vmem %s1034_s12, 4096  ;;  %p916_p12 = scmp.lt.s32.totalorder %s1034_s12, %s1034_s12 }
  0x1b   :  { %p912_p11 = scmp.ne.s32.totalorder %s1034_s12, %s911_s13  ;;  %p917_p13 = scmp.lt.s32.totalorder %s911_s13, %s911_s13 }
  0x1d   :  { %p918_p0 = por %p917_p13, %p916_p12 }
  0x1f   :  { %p919_p1 = pnand %p918_p0, %p912_p11 }
  0x21   :  { %922 = shalt.err (!%p919_p1)
}
  0x22   :  { %30 = dma.hbm_to_vmem [thread:$0]  %s1141_s1, 4096, %s1034_s12, [#allocation3], %s975_s21, %s975_s21, %s976_s22  }
  0x23   :  { %s977_s14 = smov [#allocation6]   ;;  %s923_s18 = scalar_lea.hbm %s1145_s5, 2048 }
  0x24   :  { %s52_s15 = sshll.u32 %s977_s14, 4  ;;  %p924_p2 = scmp.ne.s32.totalorder %s1145_s5, %s923_s18  ;;  %s53_s15 = int_to_ptr.vmem [resolvable:$true] %s52_s15 }
  0x25   :  { %p927_p3 = scmp.lt.u32.totalorder %s923_s18, %s1145_s5 }
  0x27   :  { %p929_p4 = pnand %p927_p3, %p924_p2 }
  0x29   :  { %932 = shalt.err (!%p929_p4)
}
  0x2a   :  { %s933_s25 = scalar_lea.vmem %s53_s15, 2048  ;;  %p938_p6 = scmp.lt.s32.totalorder %s53_s15, %s53_s15 }
  0x2b   :  { %p934_p5 = scmp.ne.s32.totalorder %s53_s15, %s933_s25  ;;  %p939_p7 = scmp.lt.s32.totalorder %s933_s25, %s933_s25 }
  0x2d   :  { %p940_p8 = por %p939_p7, %p938_p6 }
  0x2f   :  { %p941_p9 = pnand %p940_p8, %p934_p5 }
  0x31   :  { %944 = shalt.err (!%p941_p9)
}
  0x32   :  { %s978_s1 = smov 128   ;;  %s979_s12 = smov 8  }
  0x33   :  { %58 = dma.hbm_to_vmem [thread:$0]  %s1145_s5, 2048, %s53_s15, [#allocation5], %s978_s1, %s978_s1, %s979_s12  }
  0x34   :  { %s980_s26 = smov [#allocation7]   ;;  %s945_s30 = scalar_lea.hbm %s1147_s7, 2048 }
  0x35   :  { %s66_s27 = sshll.u32 %s980_s26, 4  ;;  %p946_p10 = scmp.ne.s32.totalorder %s1147_s7, %s945_s30  ;;  %s67_s27 = int_to_ptr.vmem [resolvable:$true] %s66_s27 }
  0x36   :  { %p949_p11 = scmp.lt.u32.totalorder %s945_s30, %s1147_s7 }
  0x38   :  { %p951_p12 = pnand %p949_p11, %p946_p10 }
  0x3a   :  { %954 = shalt.err (!%p951_p12)
}
  0x3b   :  { %s955_s14 = scalar_lea.vmem %s67_s27, 2048  ;;  %p960_p0 = scmp.lt.s32.totalorder %s67_s27, %s67_s27 }
  0x3c   :  { %p956_p13 = scmp.ne.s32.totalorder %s67_s27, %s955_s14  ;;  %p961_p1 = scmp.lt.s32.totalorder %s955_s14, %s955_s14 }
  0x3e   :  { %p962_p2 = por %p961_p1, %p960_p0 }
  0x40   :  { %p963_p3 = pnand %p962_p2, %p956_p13 }
  0x42   :  { %966 = shalt.err (!%p963_p3)
}
  0x43   :  { %72 = dma.hbm_to_vmem [thread:$0]  %s1147_s7, 2048, %s67_s27, [#allocation8], %s978_s1, %s978_s1, %s979_s12  }
  0x44   :  { %967 = dma.done.wait [#allocation3], 4096  }
  0x45   :  { %968 = vsyncadd [#allocation3], 4294963200 }
  0x46   :  { %969 = dma.done.wait [#allocation5], 10240  }
  0x47   :  { %970 = vsyncadd [#allocation5], 4294957056 }
  0x48   :  { %971 = dma.done.wait [#allocation8], 2048  }
  0x49   :  { %972 = vsyncadd [#allocation8], 4294965248  ;;  %v981_v0 = vmov 0.0   ;;  %v89_v1 = vld [vmem:[#allocation2 + $0x8] sm:$0xff]  ;;  %v91_v2 = vld [vmem:[#allocation2 + $0x18] sm:$0xff]  ;;  %vm983_vm0 = vmmov 0  }
  0x4a   :  { %196 = vmatprep.mubr.f32.mxu0 %v981_v0  ;;  %v88_v3 = vld [vmem:[#allocation2] sm:$0xff]  ;;  %v704_v4 = vpack.c.bf16 %v91_v2, %v89_v1  ;;  %v90_v5 = vld [vmem:[#allocation2 + $0x10] sm:$0xff]  ;;  %v93_v6 = vld [vmem:[#allocation2 + $0x28] sm:$0xff] }
  0x4b   :  { %v95_v7 = vld [vmem:[#allocation2 + $0x38] sm:$0xff]  ;;  %v706_v8 = vpack.c.bf16 %v90_v5, %v88_v3  ;;  %v92_v10 = vld [vmem:[#allocation2 + $0x20] sm:$0xff]  ;;  %v94_v11 = vld [vmem:[#allocation2 + $0x30] sm:$0xff] }
  0x4c   :  { %v708_v9 = vpack.c.bf16 %v95_v7, %v93_v6  ;;  %v97_v12 = vld [vmem:[#allocation2 + $0x48] sm:$0xff]  ;;  %705 = vmatprep.subr.bf16.mxu0 %v704_v4  ;;  %v99_v13 = vld [vmem:[#allocation2 + $0x58] sm:$0xff]  ;;  %v710_v14 = vpack.c.bf16 %v94_v11, %v92_v10  ;;  %v96_v16 = vld [vmem:[#allocation2 + $0x40] sm:$0xff] }
  0x4d   :  { %707 = vmatpush1.bf16.msra.mxu0 %v706_v8  ;;  %v712_v15 = vpack.c.bf16 %v99_v13, %v97_v12  ;;  %v98_v17 = vld [vmem:[#allocation2 + $0x50] sm:$0xff]  ;;  %v101_v18 = vld [vmem:[#allocation2 + $0x68] sm:$0xff]  ;;  %v103_v19 = vld [vmem:[#allocation2 + $0x78] sm:$0xff] }
  0x4e   :  { %709 = vmatprep.subr.bf16.mxu0 %v708_v9  ;;  %v714_v20 = vpack.c.bf16 %v98_v17, %v96_v16  ;;  %v716_v21 = vpack.c.bf16 %v103_v19, %v101_v18  ;;  %v100_v22 = vld [vmem:[#allocation2 + $0x60] sm:$0xff]  ;;  %v102_v23 = vld [vmem:[#allocation2 + $0x70] sm:$0xff]  ;;  %v105_v24 = vld [vmem:[#allocation2 + $0x88] sm:$0xff] }
  0x4f   :  { %v107_v25 = vld [vmem:[#allocation2 + $0x98] sm:$0xff]  ;;  %v104_v26 = vld [vmem:[#allocation2 + $0x80] sm:$0xff]  ;;  %v106_v27 = vld [vmem:[#allocation2 + $0x90] sm:$0xff]  ;;  %v718_v31 = vpack.c.bf16 %v102_v23, %v100_v22 }
  0x50   :  { %v224_v28 = vld [vmem:[#allocation4 + $0x8] sm:$0xff]  ;;  %v226_v29 = vld [vmem:[#allocation4 + $0x18] sm:$0xff]  ;;  %v223_v30 = vld [vmem:[#allocation4] sm:$0xff]  ;;  %v720_v36 = vpack.c.bf16 %v107_v25, %v105_v24  ;;  %v722_v46 = vpack.c.bf16 %v106_v27, %v104_v26 }
  0x51   :  { %711 = vmatpush1.bf16.msra.mxu0 %v710_v14  ;;  %v736_v32 = vpack.c.bf16 %v226_v29, %v224_v28  ;;  %v225_v33 = vld [vmem:[#allocation4 + $0x10] sm:$0xff]  ;;  %v228_v34 = vld [vmem:[#allocation4 + $0x28] sm:$0xff]  ;;  %v230_v35 = vld [vmem:[#allocation4 + $0x38] sm:$0xff] }
  0x52   :  { %713 = vmatprep.subr.bf16.mxu0 %v712_v15  ;;  %v738_v37 = vpack.c.bf16 %v225_v33, %v223_v30  ;;  %v740_v38 = vpack.c.bf16 %v230_v35, %v228_v34  ;;  %v227_v39 = vld [vmem:[#allocation4 + $0x20] sm:$0xff]  ;;  %v229_v40 = vld [vmem:[#allocation4 + $0x30] sm:$0xff]  ;;  %v232_v41 = vld [vmem:[#allocation4 + $0x48] sm:$0xff] }
  0x53   :  { %v109_v42 = vld [vmem:[#allocation2 + $0xa8] sm:$0xff]  ;;  %v111_v43 = vld [vmem:[#allocation2 + $0xb8] sm:$0xff]  ;;  %737 = vmatprep.subr.bf16.mxu1 %v736_v32  ;;  %v742_v45 = vpack.c.bf16 %v229_v40, %v227_v39  ;;  %v108_v47 = vld [vmem:[#allocation2 + $0xa0] sm:$0xff] }
  0x54   :  { %v234_v44 = vld [vmem:[#allocation4 + $0x58] sm:$0xff]  ;;  %739 = vmatpush1.bf16.msra.mxu1 %v738_v37  ;;  %v231_v49 = vld [vmem:[#allocation4 + $0x40] sm:$0xff]  ;;  %v233_v50 = vld [vmem:[#allocation4 + $0x50] sm:$0xff]  ;;  %v724_v51 = vpack.c.bf16 %v111_v43, %v109_v42 }
  0x55   :  { %715 = vmatpush1.bf16.msra.mxu0 %v714_v20  ;;  %741 = vmatprep.subr.bf16.mxu1 %v740_v38  ;;  %v744_v48 = vpack.c.bf16 %v234_v44, %v232_v41  ;;  %v110_v52 = vld [vmem:[#allocation2 + $0xb0] sm:$0xff]  ;;  %v236_v53 = vld [vmem:[#allocation4 + $0x68] sm:$0xff]  ;;  %v238_v54 = vld [vmem:[#allocation4 + $0x78] sm:$0xff]  ;;  %v746_v57 = vpack.c.bf16 %v233_v50, %v231_v49 }
  0x56   :  { %717 = vmatprep.subr.bf16.mxu0 %v716_v21  ;;  %v113_v55 = vld [vmem:[#allocation2 + $0xc8] sm:$0xff]  ;;  %v115_v56 = vld [vmem:[#allocation2 + $0xd8] sm:$0xff]  ;;  %v726_v58 = vpack.c.bf16 %v110_v52, %v108_v47  ;;  %v112_v59 = vld [vmem:[#allocation2 + $0xc0] sm:$0xff]  ;;  %v748_v60 = vpack.c.bf16 %v238_v54, %v236_v53 }
  0x57   :  { %v235_v61 = vld [vmem:[#allocation4 + $0x60] sm:$0xff]  ;;  %v237_v62 = vld [vmem:[#allocation4 + $0x70] sm:$0xff]  ;;  %v728_v63 = vpack.c.bf16 %v115_v56, %v113_v55  ;;  %v240_v2 = vld [vmem:[#allocation4 + $0x88] sm:$0xff] }
  0x58   :  { %743 = vmatpush1.bf16.msra.mxu1 %v742_v45  ;;  %v114_v1 = vld [vmem:[#allocation2 + $0xd0] sm:$0xff]  ;;  %v242_v3 = vld [vmem:[#allocation4 + $0x98] sm:$0xff]  ;;  %v117_v4 = vld [vmem:[#allocation2 + $0xe8] sm:$0xff]  ;;  %v750_v6 = vpack.c.bf16 %v237_v62, %v235_v61 }
  0x59   :  { %719 = vmatpush1.bf16.msra.mxu0 %v718_v31  ;;  %745 = vmatprep.subr.bf16.mxu1 %v744_v48  ;;  %v119_v5 = vld [vmem:[#allocation2 + $0xf8] sm:$0xff]  ;;  %v730_v7 = vpack.c.bf16 %v114_v1, %v112_v59  ;;  %v116_v8 = vld [vmem:[#allocation2 + $0xe0] sm:$0xff]  ;;  %v752_v9 = vpack.c.bf16 %v242_v3, %v240_v2  ;;  %v241_v11 = vld [vmem:[#allocation4 + $0x90] sm:$0xff] }
  0x5a   :  { %721 = vmatprep.subr.bf16.mxu0 %v720_v36  ;;  %v239_v10 = vld [vmem:[#allocation4 + $0x80] sm:$0xff]  ;;  %v732_v12 = vpack.c.bf16 %v119_v5, %v117_v4  ;;  %v118_v13 = vld [vmem:[#allocation2 + $0xf0] sm:$0xff]  ;;  %v244_v14 = vld [vmem:[#allocation4 + $0xa8] sm:$0xff] }
  0x5b   :  { %v246_v15 = vld [vmem:[#allocation4 + $0xb8] sm:$0xff]  ;;  %v754_v16 = vpack.c.bf16 %v241_v11, %v239_v10  ;;  %v734_v17 = vpack.c.bf16 %v118_v13, %v116_v8  ;;  %v243_v19 = vld [vmem:[#allocation4 + $0xa0] sm:$0xff]  ;;  %v245_v20 = vld [vmem:[#allocation4 + $0xb0] sm:$0xff] }
  0x5c   :  { %747 = vmatpush1.bf16.msra.mxu1 %v746_v57  ;;  %v756_v18 = vpack.c.bf16 %v246_v15, %v244_v14  ;;  %v758_v21 = vpack.c.bf16 %v245_v20, %v243_v19  ;;  %v87_v22 = vld [vmem:[%s1140_s0] sm:$0xff]  ;;  %v248_v23 = vld [vmem:[#allocation4 + $0xc8] sm:$0xff]  ;;  %v250_v24 = vld [vmem:[#allocation4 + $0xd8] sm:$0xff]  ;;  %v122_v20 = vlaneseq }
  0x5d   :  { %723 = vmatpush1.bf16.msra.mxu0 %v722_v46  ;;  %749 = vmatprep.subr.bf16.mxu1 %v748_v60  ;;  %v760_v25 = vpack.c.bf16 %v250_v24, %v248_v23  ;;  %v247_v26 = vld [vmem:[#allocation4 + $0xc0] sm:$0xff]  ;;  %v249_v27 = vld [vmem:[#allocation4 + $0xd0] sm:$0xff]  ;;  %v252_v29 = vld [vmem:[#allocation4 + $0xe8] sm:$0xff] }
  0x5e   :  { %725 = vmatprep.subr.bf16.mxu0 %v724_v51  ;;  %v762_v28 = vpack.c.bf16 %v249_v27, %v247_v26  ;;  %v254_v30 = vld [vmem:[#allocation4 + $0xf8] sm:$0xff]  ;;  %v251_v32 = vld [vmem:[#allocation4 + $0xe0] sm:$0xff]  ;;  %v253_v33 = vld [vmem:[#allocation4 + $0xf0] sm:$0xff] }
  0x5f   :  { %v764_v31 = vpack.c.bf16 %v254_v30, %v252_v29  ;;  %v766_v34 = vpack.c.bf16 %v253_v33, %v251_v32  ;;  %v256_v35 = vld [vmem:[#allocation4 + $0x108] sm:$0xff]  ;;  %v258_v36 = vld [vmem:[#allocation4 + $0x118] sm:$0xff]  ;;  %v255_v38 = vld [vmem:[#allocation4 + $0x100] sm:$0xff] }
  0x60   :  { %751 = vmatpush1.bf16.msra.mxu1 %v750_v6  ;;  %v768_v37 = vpack.c.bf16 %v258_v36, %v256_v35  ;;  %v257_v39 = vld [vmem:[#allocation4 + $0x110] sm:$0xff]  ;;  %v260_v41 = vld [vmem:[#allocation4 + $0x128] sm:$0xff]  ;;  %v262_v42 = vld [vmem:[#allocation4 + $0x138] sm:$0xff] }
  0x61   :  { %727 = vmatpush1.bf16.msra.mxu0 %v726_v58  ;;  %753 = vmatprep.subr.bf16.mxu1 %v752_v9  ;;  %v770_v40 = vpack.c.bf16 %v257_v39, %v255_v38  ;;  %v772_v43 = vpack.c.bf16 %v262_v42, %v260_v41  ;;  %v259_v44 = vld [vmem:[#allocation4 + $0x120] sm:$0xff]  ;;  %v261_v45 = vld [vmem:[#allocation4 + $0x130] sm:$0xff]  ;;  %v264_v47 = vld [vmem:[#allocation4 + $0x148] sm:$0xff] }
  0x62   :  { %729 = vmatprep.subr.bf16.mxu0 %v728_v63  ;;  %v774_v46 = vpack.c.bf16 %v261_v45, %v259_v44  ;;  %v266_v48 = vld [vmem:[#allocation4 + $0x158] sm:$0xff]  ;;  %v263_v50 = vld [vmem:[#allocation4 + $0x140] sm:$0xff]  ;;  %v265_v51 = vld [vmem:[#allocation4 + $0x150] sm:$0xff] }
  0x63   :  { %v776_v49 = vpack.c.bf16 %v266_v48, %v264_v47  ;;  %v778_v52 = vpack.c.bf16 %v265_v51, %v263_v50  ;;  %v268_v53 = vld [vmem:[#allocation4 + $0x168] sm:$0xff]  ;;  %v270_v54 = vld [vmem:[#allocation4 + $0x178] sm:$0xff]  ;;  %v267_v56 = vld [vmem:[#allocation4 + $0x160] sm:$0xff] }
  0x64   :  { %755 = vmatpush1.bf16.msra.mxu1 %v754_v16  ;;  %v780_v55 = vpack.c.bf16 %v270_v54, %v268_v53  ;;  %v269_v57 = vld [vmem:[#allocation4 + $0x170] sm:$0xff]  ;;  %v272_v59 = vld [vmem:[#allocation4 + $0x188] sm:$0xff]  ;;  %v274_v60 = vld [vmem:[#allocation4 + $0x198] sm:$0xff]  ;;  %v982_v54 = vmov 0.0|0.0  }
  0x65   :  { %731 = vmatpush1.bf16.msra.mxu0 %v730_v7  ;;  %757 = vmatprep.subr.bf16.mxu1 %v756_v18  ;;  %v782_v58 = vpack.c.bf16 %v269_v57, %v267_v56  ;;  %v784_v61 = vpack.c.bf16 %v274_v60, %v272_v59  ;;  %v271_v62 = vld [vmem:[#allocation4 + $0x180] sm:$0xff]  ;;  %v273_v63 = vld [vmem:[#allocation4 + $0x190] sm:$0xff]  ;;  %v276_v2 = vld [vmem:[#allocation4 + $0x1a8] sm:$0xff] }
  0x66   :  { %733 = vmatprep.subr.bf16.mxu0 %v732_v12  ;;  %v786_v1 = vpack.c.bf16 %v273_v63, %v271_v62  ;;  %v278_v3 = vld [vmem:[#allocation4 + $0x1b8] sm:$0xff]  ;;  %v275_v5 = vld [vmem:[#allocation4 + $0x1a0] sm:$0xff]  ;;  %v277_v6 = vld [vmem:[#allocation4 + $0x1b0] sm:$0xff] }
  0x67   :  { %v788_v4 = vpack.c.bf16 %v278_v3, %v276_v2  ;;  %v790_v7 = vpack.c.bf16 %v277_v6, %v275_v5  ;;  %v280_v8 = vld [vmem:[#allocation4 + $0x1c8] sm:$0xff]  ;;  %v282_v9 = vld [vmem:[#allocation4 + $0x1d8] sm:$0xff]  ;;  %v279_v11 = vld [vmem:[#allocation4 + $0x1c0] sm:$0xff] }
  0x68   :  { %759 = vmatpush1.bf16.msra.mxu1 %v758_v21  ;;  %v792_v10 = vpack.c.bf16 %v282_v9, %v280_v8  ;;  %v281_v12 = vld [vmem:[#allocation4 + $0x1d0] sm:$0xff]  ;;  %v284_v14 = vld [vmem:[#allocation4 + $0x1e8] sm:$0xff]  ;;  %v286_v15 = vld [vmem:[#allocation4 + $0x1f8] sm:$0xff]  ;;  %v1093_v21 = vshrl.u32 %v122_v20, 7 }
  0x69   :  { %735 = vmatpush1.bf16.msra.mxu0 %v734_v17  ;;  %761 = vmatprep.subr.bf16.mxu1 %v760_v25  ;;  %v794_v13 = vpack.c.bf16 %v281_v12, %v279_v11  ;;  %v796_v16 = vpack.c.bf16 %v286_v15, %v284_v14  ;;  %v283_v17 = vld [vmem:[#allocation4 + $0x1e0] sm:$0xff]  ;;  %v285_v18 = vld [vmem:[#allocation4 + $0x1f0] sm:$0xff]  ;;  %v393_v56 = vld [vmem:[#allocation6 + $0x18] sm:$0xff] }
  0x6a   :  { %v798_v19 = vpack.c.bf16 %v285_v18, %v283_v17  ;;  %v120_v23 = vld [vmem:[%s1142_s2] sm:$0x3]  ;;  %v128_v24 = vsub.s32 1, %v1093_v21  ;;  %800 = vmatprep.subr.bf16.mxu0 %v982_v54  ;;  %v395_v59 = vld [vmem:[#allocation6 + $0x28] sm:$0xff]  ;;  %v397_v62 = vld [vmem:[#allocation6 + $0x38] sm:$0xff] }
  0x6b   :  { %v390_v51 = vld [vmem:[#allocation6] sm:$0xff]  ;;  %v399_v2 = vld [vmem:[#allocation6 + $0x48] sm:$0xff]  ;;  %v401_v5 = vld [vmem:[#allocation6 + $0x58] sm:$0xff] }
  0x6c   :  { %197 = vmatmul.mubr.f32.vlgmr.msra.gmra.mrb[0].mxu0 %v87_v22  ;;  %763 = vmatpush1.bf16.msra.mxu1 %v762_v28  ;;  %v124_v22 = vsub.s32 0, %v1093_v21  ;;  %v129_v26 = vrot.slane %v120_v23, %v128_v24  ;;  %v403_v8 = vld [vmem:[#allocation6 + $0x68] sm:$0xff]  ;;  %v405_v11 = vld [vmem:[#allocation6 + $0x78] sm:$0xff] }
  0x6d   :  { %765 = vmatprep.subr.bf16.mxu1 %v764_v31  ;;  %666 = vmatprep.mubr.msk.f32.mxu0 %vm983_vm0, %v981_v0  ;;  %v495_v21 = vld [vmem:[#allocation7 + $0x18] sm:$0xff] }
  0x6e   :  { %v125_v25 = vrot.slane %v120_v23, %v124_v22 }
  0x70   :  { %767 = vmatpush1.bf16.msra.mxu1 %v766_v34 }
  0x71   :  { %769 = vmatprep.subr.bf16.mxu1 %v768_v37 }
  0x74   :  { %771 = vmatpush1.bf16.msra.mxu1 %v770_v40 }
  0x75   :  { %773 = vmatprep.subr.bf16.mxu1 %v772_v43 }
  0x78   :  { %775 = vmatpush1.bf16.msra.mxu1 %v774_v46 }
  0x79   :  { %777 = vmatprep.subr.bf16.mxu1 %v776_v49 }
  0x7c   :  { %779 = vmatpush1.bf16.msra.mxu1 %v778_v52  ;;  %v391_v52 = vld [vmem:[#allocation6 + $0x8] sm:$0xff] }
  0x7d   :  { %781 = vmatprep.subr.bf16.mxu1 %v780_v55  ;;  %v801_v53 = vpack.c.bf16 %v391_v52, %v390_v51  ;;  %v392_v55 = vld [vmem:[#allocation6 + $0x10] sm:$0xff]  ;;  %v503_v51 = vld [vmem:[#allocation7 + $0x58] sm:$0xff] }
  0x7e   :  { %v804_v57 = vpack.c.bf16 %v393_v56, %v392_v55  ;;  %v505_v55 = vld [vmem:[#allocation7 + $0x68] sm:$0xff] }
  0x7f   :  { %802 = vmatpush3.bf16.msra.mxu0 %v801_v53  ;;  %v504_v53 = vld [vmem:[#allocation7 + $0x60] sm:$0xff] }
  0x80   :  { %783 = vmatpush1.bf16.msra.mxu1 %v782_v58  ;;  %803 = vmatprep.subr.bf16.mxu0 %v982_v54  ;;  %v394_v58 = vld [vmem:[#allocation6 + $0x20] sm:$0xff]  ;;  %v843_v56 = vpack.c.bf16 %v505_v55, %v504_v53 }
  0x81   :  { %785 = vmatprep.subr.bf16.mxu1 %v784_v61  ;;  %v807_v60 = vpack.c.bf16 %v395_v59, %v394_v58  ;;  %v396_v61 = vld [vmem:[#allocation6 + $0x30] sm:$0xff]  ;;  %v507_v58 = vld [vmem:[#allocation7 + $0x78] sm:$0xff] }
  0x82   :  { %v810_v63 = vpack.c.bf16 %v397_v62, %v396_v61 }
  0x83   :  { %805 = vmatpush3.bf16.msra.mxu0 %v804_v57  ;;  %v506_v57 = vld [vmem:[#allocation7 + $0x70] sm:$0xff] }
  0x84   :  { %787 = vmatpush1.bf16.msra.mxu1 %v786_v1  ;;  %806 = vmatprep.subr.bf16.mxu0 %v982_v54  ;;  %v398_v1 = vld [vmem:[#allocation6 + $0x40] sm:$0xff]  ;;  %v846_v61 = vpack.c.bf16 %v507_v58, %v506_v57 }
  0x85   :  { %789 = vmatprep.subr.bf16.mxu1 %v788_v4  ;;  %v813_v3 = vpack.c.bf16 %v399_v2, %v398_v1  ;;  %v400_v4 = vld [vmem:[#allocation6 + $0x50] sm:$0xff]  ;;  %v598_v1 = vld [vmem:[%s1146_s6] ss:$0 sm:$0xff] }
  0x86   :  { %v816_v6 = vpack.c.bf16 %v401_v5, %v400_v4 }
  0x87   :  { %808 = vmatpush3.bf16.msra.mxu0 %v807_v60 }
  0x88   :  { %791 = vmatpush1.bf16.msra.mxu1 %v790_v7  ;;  %809 = vmatprep.subr.bf16.mxu0 %v982_v54  ;;  %v402_v7 = vld [vmem:[#allocation6 + $0x60] sm:$0xff] }
  0x89   :  { %793 = vmatprep.subr.bf16.mxu1 %v792_v10  ;;  %v819_v9 = vpack.c.bf16 %v403_v8, %v402_v7  ;;  %v404_v10 = vld [vmem:[#allocation6 + $0x70] sm:$0xff] }
  0x8a   :  { %v822_v12 = vpack.c.bf16 %v405_v11, %v404_v10  ;;  %v599_v11 = vld [vmem:[%s1148_s8] ss:$0 sm:$0xff] }
  0x8b   :  { %811 = vmatpush3.bf16.msra.mxu0 %v810_v63 }
  0x8c   :  { %795 = vmatpush1.bf16.msra.mxu1 %v794_v13  ;;  %812 = vmatprep.subr.bf16.mxu0 %v982_v54  ;;  %v287_v13 = vld [vmem:[%s1144_s4] sm:$0x3] }
  0x8d   :  { %797 = vmatprep.subr.bf16.mxu1 %v796_v16  ;;  %v292_v14 = vrot.slane %v287_v13, %v124_v22  ;;  %v296_v20 = vrot.slane %v287_v13, %v128_v24  ;;  %v492_v22 = vld [vmem:[#allocation7] sm:$0xff] }
  0x8f   :  { %814 = vmatpush3.bf16.msra.mxu0 %v813_v3 }
  0x90   :  { %799 = vmatpush1.bf16.msra.mxu1 %v798_v19  ;;  %815 = vmatprep.subr.bf16.mxu0 %v982_v54 }
  0x93   :  { %817 = vmatpush3.bf16.msra.mxu0 %v816_v6 }
  0x94   :  { %818 = vmatprep.subr.bf16.mxu0 %v982_v54 }
  0x97   :  { %820 = vmatpush3.bf16.msra.mxu0 %v819_v9 }
  0x98   :  { %821 = vmatprep.subr.bf16.mxu0 %v982_v54 }
  0x9b   :  { %823 = vmatpush3.bf16.msra.mxu0 %v822_v12 }
  0x9c   :  { %824 = vmatprep.subr.bf16.mxu0 %v982_v54 }
 0x13f   :  { %v198_v27 = vpop.f32.mrb[0].mxu0 }
 0x140   :  { %v199_v28 = vadd.f32 %v198_v27, %v125_v25  ;;  %v200_v29 = vpop.f32.mrb[1].mxu0 }
 0x141   :  { %v201_v30 = vadd.f32 %v200_v29, %v129_v26 }
 0x142   :  { %v203_v31 = vmin.f32 %v199_v28, 20.0 }
 0x143   :  { %v204_v32 = vmin.f32 %v201_v30, 20.0 }
 0x144   :  { %v205_v33 = vmul.f32 1.442695, %v203_v31 }
 0x145   :  { %v207_v34 = vmul.f32 1.442695, %v204_v32  ;;  %v493_v32 = vld [vmem:[#allocation7 + $0x8] sm:$0xff] }
 0x146   :  { %859 = vpow2.f32 %v205_v33 }
 0x147   :  { %861 = vpow2.f32 %v207_v34 }
 0x150   :  { %v860_v35 = vpop.eup %859 }
 0x151   :  { %v862_v36 = vpop.eup %861  ;;  %v209_v37 = vadd.f32 1.0, %v860_v35  ;;  %v825_v35 = vpack.c.bf16 %v493_v32, %v492_v22 }
 0x152   :  { %v210_v38 = vadd.f32 1.0, %v862_v36 }
 0x153   :  { %v211_v39 = vmul.f32 %v209_v37, %v209_v37 }
 0x154   :  { %v212_v40 = vmul.f32 %v210_v38, %v210_v38  ;;  %v494_v38 = vld [vmem:[#allocation7 + $0x10] sm:$0xff] }
 0x155   :  { %v215_v41 = vadd.f32 1.0, %v211_v39  ;;  %v594_v43 = vadd.f32 -1.0, %v211_v39  ;;  %v828_v39 = vpack.c.bf16 %v495_v21, %v494_v38 }
 0x156   :  { %v216_v42 = vadd.f32 1.0, %v212_v40  ;;  %v595_v45 = vadd.f32 -1.0, %v212_v40  ;;  %v496_v40 = vld [vmem:[#allocation7 + $0x20] sm:$0xff] }
 0x157   :  { %863 = vrcp.f32 %v215_v41  ;;  %v497_v41 = vld [vmem:[#allocation7 + $0x28] sm:$0xff] }
 0x158   :  { %865 = vrcp.f32 %v216_v42 }
 0x161   :  { %v864_v44 = vpop.eup %863 }
 0x162   :  { %v866_v46 = vpop.eup %865  ;;  %v219_v47 = vmul.f32 %v864_v44, %v594_v43  ;;  %v831_v43 = vpack.c.bf16 %v497_v41, %v496_v40  ;;  %v498_v44 = vld [vmem:[#allocation7 + $0x30] sm:$0xff] }
 0x163   :  { %v220_v48 = vmul.f32 %v866_v46, %v595_v45  ;;  %v499_v45 = vld [vmem:[#allocation7 + $0x38] sm:$0xff] }
 0x164   :  { %v221_v50 = vmul.f32 %v219_v47, %v199_v28  ;;  %v834_v47 = vpack.c.bf16 %v499_v45, %v498_v44 }
 0x165   :  { %v222_v49 = vmul.f32 %v220_v48, %v201_v30  ;;  %v500_v48 = vld [vmem:[#allocation7 + $0x40] sm:$0xff] }
 0x167   :  { %363 = vmatprep.mubr.f32.mxu1 %v222_v49  ;;  %v501_v49 = vld [vmem:[#allocation7 + $0x48] sm:$0xff] }
 0x168   :  { %364 = vmatmul.mubr.f32.vlgmr.msra.gmra.mrb[0].mxu1 %v221_v50  ;;  %v502_v50 = vld [vmem:[#allocation7 + $0x50] sm:$0xff] }
 0x169   :  { %v840_v52 = vpack.c.bf16 %v503_v51, %v502_v50 }
 0x23b   :  { %v365_v15 = vpop.f32.mrb[0].mxu1 }
 0x23c   :  { %v366_v16 = vadd.f32 %v365_v15, %v292_v14  ;;  %v367_v17 = vpop.f32.mrb[1].mxu1 }
 0x23d   :  { %v368_v23 = vadd.f32 %v367_v17, %v296_v20 }
 0x23e   :  { %v370_v18 = vmin.f32 %v366_v16, 20.0 }
 0x23f   :  { %v371_v27 = vmin.f32 %v368_v23, 20.0 }
 0x240   :  { %v372_v19 = vmul.f32 1.442695, %v370_v18 }
 0x241   :  { %v374_v30 = vmul.f32 1.442695, %v371_v27 }
 0x242   :  { %867 = vpow2.f32 %v372_v19 }
 0x24c   :  { %v868_v25 = vpop.eup %867 }
 0x24d   :  { %v376_v26 = vadd.f32 1.0, %v868_v25 }
 0x24f   :  { %v378_v28 = vmul.f32 %v376_v26, %v376_v26 }
 0x251   :  { %v382_v29 = vadd.f32 1.0, %v378_v28  ;;  %v596_v31 = vadd.f32 -1.0, %v378_v28 }
 0x253   :  { %869 = vrcp.f32 %v382_v29 }
 0x254   :  { %871 = vpow2.f32 %v374_v30 }
 0x25d   :  { %v870_v33 = vpop.eup %869 }
 0x25e   :  { %v386_v34 = vmul.f32 %v870_v33, %v596_v31  ;;  %v872_v36 = vpop.eup %871 }
 0x25f   :  { %v377_v24 = vadd.f32 1.0, %v872_v36 }
 0x260   :  { %v388_v37 = vmul.f32 %v386_v34, %v366_v16 }
 0x261   :  { %v379_v42 = vmul.f32 %v377_v24, %v377_v24 }
 0x262   :  { %667 = vmatmul.mubr.f32.vlgmr.msra.gmra.mrb[2].mxu0 %v388_v37 }
 0x263   :  { %826 = vmatpush3.bf16.msra.mxu0 %v825_v35  ;;  %701 = vmatprep.mubr.msk.f32.mxu0 %vm983_vm0, %v981_v0  ;;  %v383_v46 = vadd.f32 1.0, %v379_v42  ;;  %v837_v0 = vpack.c.bf16 %v501_v49, %v500_v48  ;;  %v597_v60 = vadd.f32 -1.0, %v379_v42 }
 0x264   :  { %827 = vmatprep.subr.bf16.mxu0 %v982_v54 }
 0x265   :  { %873 = vrcp.f32 %v383_v46 }
 0x267   :  { %829 = vmatpush3.bf16.msra.mxu0 %v828_v39 }
 0x268   :  { %830 = vmatprep.subr.bf16.mxu0 %v982_v54 }
 0x26b   :  { %832 = vmatpush3.bf16.msra.mxu0 %v831_v43 }
 0x26c   :  { %833 = vmatprep.subr.bf16.mxu0 %v982_v54 }
 0x26f   :  { %835 = vmatpush3.bf16.msra.mxu0 %v834_v47  ;;  %v874_v59 = vpop.eup %873 }
 0x270   :  { %836 = vmatprep.subr.bf16.mxu0 %v982_v54  ;;  %v387_v62 = vmul.f32 %v874_v59, %v597_v60 }
 0x272   :  { %v389_v63 = vmul.f32 %v387_v62, %v368_v23 }
 0x273   :  { %838 = vmatpush3.bf16.msra.mxu0 %v837_v0 }
 0x274   :  { %839 = vmatprep.subr.bf16.mxu0 %v982_v54 }
 0x277   :  { %841 = vmatpush3.bf16.msra.mxu0 %v840_v52 }
 0x278   :  { %842 = vmatprep.subr.bf16.mxu0 %v982_v54 }
 0x27b   :  { %844 = vmatpush3.bf16.msra.mxu0 %v843_v56 }
 0x27c   :  { %845 = vmatprep.subr.bf16.mxu0 %v982_v54 }
 0x27f   :  { %847 = vmatpush3.bf16.msra.mxu0 %v846_v61 }
 0x282   :  { %702 = vmatmul.mubr.f32.vlgmr.msra.gmra.mrb[4].mxu0 %v389_v63 }
 0x335   :  { %v479_v2 = vpop.f32.mrb[2].mxu0 }
 0x336   :  { %v480_v3 = vadd.f32 %v598_v1, %v479_v2  ;;  %v668_v4 = vpop.f32.mrb[3].mxu0 }
 0x338   :  { %483 = vmax.xlane.f32.xlu0 %v480_v3 }
 0x355   :  { %v581_v5 = vpop.f32.mrb[4].mxu0 }
 0x356   :  { %v703_v6 = vpop.f32.mrb[5].mxu0  ;;  %v582_v13 = vadd.f32 %v599_v11, %v581_v5 }
 0x3c5   :  { %v484_v7 = vpop.xlane.xlu0 %483 }
 0x3c6   :  { %v485_v8 = vsub.f32 %v480_v3, %v484_v7 }
 0x3c8   :  { %v486_v9 = vmul.f32 1.442695, %v485_v8 }
 0x3ca   :  { %875 = vpow2.f32 %v486_v9 }
 0x3d4   :  { %v876_v10 = vpop.eup %875 }
 0x3d5   :  { %488 = vadd.xlane.f32.xlu0 %v876_v10 }
 0x462   :  { %v489_v54 = vpop.xlane.xlu0 %488 }
 0x463   :  { %877 = vrcp.f32 %v489_v54 }
 0x46d   :  { %v878_v12 = vpop.eup %877 }
 0x46e   :  { %v491_v14 = vmul.f32 %v878_v12, %v876_v10 }
 0x470   :  { %v585_v15 = vadd.f32 %v582_v13, %v491_v14 }
 0x472   :  { %586 = vst [vmem:[%s1149_s9] sm:$0xff] %v585_v15 }
 0x473   :  { %591 = vsyncpa [#allocation3], 1 }
 0x474   :  { %592 = vsyncpa [#allocation5], 1 }
 0x475   :  { %593 = vsyncpa [#allocation8], 1 }

</bundles_post_ra>
